<compile_context>
chip_gen: v7x
topology: tpu7x:2x2x1
jax: 0.10.0
libtpu: 0.0.40
codegen_flags: <defaults>
</compile_context>

<pallas_src>
import functools

import jax
import jax.numpy as jnp
from jax.experimental import pallas as pl
from jax.experimental.pallas import tpu as pltpu

_LANE = 128


def _basicconv_kernel(x_ref, w_ref, scale_ref, bias_ref, out_ref, acc_ref, *,
                      kh, kw, th, w_out, stride, dilation):
    """One (batch, Cout-tile, H-row-tile) grid step.

    x_ref:     (1, Hp, Wp, Cin)       padded NHWC input slab (resident per batch)
    w_ref:     (KH, KW, Cin, TCout)   HWIO weight tile
    scale_ref: (1, TCout)             folded BN scale (gamma / sqrt(var+eps))
    bias_ref:  (1, TCout)             folded BN bias  (beta - mean*scale)
    out_ref:   (1, TH, W_out, TCout)  output tile
    acc_ref:   (TH, W_out, TCout) f32 scratch accumulator (VMEM)
    """
    h_tile = pl.program_id(2)
    row_base = h_tile * (th * stride)

    first = True
    for i in range(kh):          # static KH x KW tap loop
        for j in range(kw):
            r0 = row_base + i * dilation
            c0 = j * dilation
            if stride == 1:
                tap = x_ref[0, pl.ds(r0, th), pl.ds(c0, w_out), :]
            else:
                # Load the contiguous window, then decimate by stride.
                tap = x_ref[0, pl.ds(r0, (th - 1) * stride + 1),
                            pl.ds(c0, (w_out - 1) * stride + 1), :]
                tap = tap[::stride, ::stride, :]
            w_tap = w_ref[i, j]                              # (Cin, TCout)
            contrib = jax.lax.dot_general(                    # MXU, f32 accumulate
                tap, w_tap,
                dimension_numbers=(((2,), (0,)), ((), ())),
                preferred_element_type=jnp.float32)
            if first:
                acc_ref[...] = contrib
                first = False
            else:
                acc_ref[...] += contrib

    y = acc_ref[...] * scale_ref[...] + bias_ref[...]         # fused BatchNorm
    out_ref[0] = jnp.maximum(y, 0.0).astype(out_ref.dtype)    # ReLU


def _largest_divisor_leq(n, cap):
    for t in range(min(n, cap), 0, -1):
        if n % t == 0:
            return t
    return 1


def basic_conv2d(x_nchw, weight_oihw, gamma, beta, running_mean, running_var, *,
                 stride=1, padding=0, dilation=1, eps=1e-5,
                 compute_dtype=None, row_tile=8):
    """Pallas implementation of BasicConv2d.forward (groups=1, bias=False)."""
    N, Cin, H, W = x_nchw.shape
    Cout, Cin_w, KH, KW = weight_oihw.shape
    assert Cin_w == Cin, "only groups=1 supported"
    # TODO(synk): grouped convolution (groups > 1) not implemented.

    out_dtype = x_nchw.dtype

    # NCHW -> NHWC (pad spatially outside the kernel), OIHW -> HWIO.
    x = jnp.transpose(x_nchw, (0, 2, 3, 1))
    x = jnp.pad(x, ((0, 0), (padding, padding), (padding, padding), (0, 0)))
    w = jnp.transpose(weight_oihw, (2, 3, 1, 0))
    if compute_dtype is not None:
        x = x.astype(compute_dtype)
        w = w.astype(compute_dtype)

    Hp, Wp = H + 2 * padding, W + 2 * padding
    H_out = (Hp - dilation * (KH - 1) - 1) // stride + 1
    W_out = (Wp - dilation * (KW - 1) - 1) // stride + 1

    # Fold BatchNorm (inference / running stats) into per-channel scale+shift.
    scale = (gamma / jnp.sqrt(running_var + eps)).astype(jnp.float32)
    bias = (beta - running_mean * scale).astype(jnp.float32)

    # Lane-dense stores: pad Cout to a multiple of 128 and tile it in 128s.
    Cout_p = ((Cout + _LANE - 1) // _LANE) * _LANE
    TCout = _LANE
    if Cout_p != Cout:
        w = jnp.pad(w, ((0, 0), (0, 0), (0, 0), (0, Cout_p - Cout)))
        scale = jnp.pad(scale, (0, Cout_p - Cout))
        bias = jnp.pad(bias, (0, Cout_p - Cout))
    scale2 = scale.reshape(1, Cout_p)
    bias2 = bias.reshape(1, Cout_p)

    # Output row tile (chosen to divide H_out so no masked edge tiles needed).
    TH = _largest_divisor_leq(H_out, row_tile)
    grid = (N, Cout_p // TCout, H_out // TH)

    kernel = functools.partial(
        _basicconv_kernel, kh=KH, kw=KW, th=TH, w_out=W_out,
        stride=stride, dilation=dilation)

    # VMEM budget: 2x (double-buffered) blocks per operand + f32 scratch acc,
    # clamped to v7x's 64 MiB physical VMEM.
    isz = jnp.dtype(x.dtype).itemsize
    osz = jnp.dtype(out_dtype).itemsize
    vmem_needed = (
        2 * (Hp * Wp * Cin * isz                       # x block
             + KH * KW * Cin * TCout * isz             # w block
             + TH * W_out * TCout * osz                # out block
             + 2 * TCout * 4)                          # scale + bias blocks
        + TH * W_out * TCout * 4)                      # accumulator scratch
    vmem_limit = int(min(max(vmem_needed + (4 << 20), 16 << 20), 64 << 20))

    out_padded = pl.pallas_call(
        kernel,
        out_shape=jax.ShapeDtypeStruct((N, H_out, W_out, Cout_p), out_dtype),
        grid_spec=pltpu.PrefetchScalarGridSpec(
            num_scalar_prefetch=0,
            grid=grid,
            in_specs=[
                # Full padded spatial slab per batch element (re-used across
                # the co / h grid axes, so it is DMA'd once per batch index).
                pl.BlockSpec((1, Hp, Wp, Cin), lambda n, co, h: (n, 0, 0, 0)),
                pl.BlockSpec((KH, KW, Cin, TCout),
                             lambda n, co, h: (0, 0, 0, co)),
                pl.BlockSpec((1, TCout), lambda n, co, h: (0, co)),
                pl.BlockSpec((1, TCout), lambda n, co, h: (0, co)),
            ],
            out_specs=pl.BlockSpec((1, TH, W_out, TCout),
                                   lambda n, co, h: (n, h, 0, co)),
            scratch_shapes=[pltpu.VMEM((TH, W_out, TCout), jnp.float32)]),
        compiler_params=pltpu.CompilerParams(
            dimension_semantics=("parallel", "parallel", "arbitrary"),
            vmem_limit_bytes=vmem_limit),
    )(x, w, scale2, bias2)

    out = out_padded[..., :Cout]                       # drop padded channels
    return jnp.transpose(out, (0, 3, 1, 2))            # back to NCHW


def _reference(x_nchw, weight_oihw, gamma, beta, mean, var,
               *, stride, padding, dilation, eps=1e-5):
    """Pure-JAX reference (lax conv + BN + ReLU) for a correctness check."""
    y = jax.lax.conv_general_dilated(
        x_nchw.astype(jnp.float32), weight_oihw.astype(jnp.float32),
        window_strides=(stride, stride),
        padding=((padding, padding), (padding, padding)),
        rhs_dilation=(dilation, dilation),
        dimension_numbers=("NCHW", "OIHW", "NCHW"))
    scale = gamma / jnp.sqrt(var + eps)
    shift = beta - mean * scale
    y = y * scale[None, :, None, None] + shift[None, :, None, None]
    return jnp.maximum(y, 0.0)


if __name__ == "__main__":
    key = jax.random.PRNGKey(0)
    k_x, k_w, k_g, k_b, k_m, k_v = jax.random.split(key, 6)

    # Shapes consistent with BasicConv2d(in_planes=4, out_planes=8,
    # kernel_size=3, stride=1, padding=1).
    N, Cin, H, W = 2, 4, 16, 16
    Cout, KH, KW = 8, 3, 3
    stride, padding, dilation = 1, 1, 1

    x = jax.random.normal(k_x, (N, Cin, H, W), jnp.float32)
    weight = 0.1 * jax.random.normal(k_w, (Cout, Cin, KH, KW), jnp.float32)
    gamma = 1.0 + 0.1 * jax.random.normal(k_g, (Cout,), jnp.float32)
    beta = 0.1 * jax.random.normal(k_b, (Cout,), jnp.float32)
    running_mean = 0.1 * jax.random.normal(k_m, (Cout,), jnp.float32)
    running_var = jnp.abs(jax.random.normal(k_v, (Cout,), jnp.float32)) + 0.5

    out = basic_conv2d(x, weight, gamma, beta, running_mean, running_var,
                       stride=stride, padding=padding, dilation=dilation)
    out = jax.block_until_ready(out)

    ref = _reference(x, weight, gamma, beta, running_mean, running_var,
                     stride=stride, padding=padding, dilation=dilation)
    if not jnp.allclose(out, ref, atol=1e-4, rtol=1e-4):
        raise AssertionError("Pallas kernel does not match JAX reference")

    print("KERNEL_OK")
</pallas_src>

<mosaic_0001>
module attributes {stable_mosaic.version = 11 : i64} {
  func.func @_basicconv_kernel(%arg0: i32, %arg1: i32, %arg2: i32, %arg3: memref<1x18x18x4xf32, #tpu.memory_space<vmem>>, %arg4: memref<3x3x4x128xf32, #tpu.memory_space<vmem>>, %arg5: memref<1x128xf32, #tpu.memory_space<vmem>>, %arg6: memref<1x128xf32, #tpu.memory_space<vmem>>, %arg7: memref<1x8x16x128xf32, #tpu.memory_space<vmem>>, %arg8: memref<8x16x128xf32, #tpu.memory_space<vmem>>) attributes {dimension_semantics = [#tpu.dimension_semantics<parallel>, #tpu.dimension_semantics<parallel>, #tpu.dimension_semantics<arbitrary>], iteration_bounds = array<i64: 2, 1, 2>, scalar_prefetch = 0 : i64, scratch_operands = 1 : i64, tpu.core_type = #tpu.core_type<tc>, window_params = [{transform_indices = @transform_0, window_bounds = array<i64: 1, 18, 18, 4>}, {transform_indices = @transform_1, window_bounds = array<i64: 3, 3, 4, 128>}, {transform_indices = @transform_2, window_bounds = array<i64: 1, 128>}, {transform_indices = @transform_3, window_bounds = array<i64: 1, 128>}, {transform_indices = @transform_4, window_bounds = array<i64: 1, 8, 16, 128>}]} {
    %c8_i32 = arith.constant 8 : i32
    %0 = arith.muli %arg2, %c8_i32 : i32
    %c0_i32 = arith.constant 0 : i32
    %1 = arith.addi %0, %c0_i32 : i32
    %c0 = arith.constant 0 : index
    %2 = arith.index_cast %1 : i32 to index
    %c0_0 = arith.constant 0 : index
    %c0_1 = arith.constant 0 : index
    %3 = vector.load %arg3[%c0, %2, %c0_0, %c0_1] : memref<1x18x18x4xf32, #tpu.memory_space<vmem>>, vector<1x8x16x4xf32>
    %4 = vector.shape_cast %3 : vector<1x8x16x4xf32> to vector<8x16x4xf32>
    %c0_2 = arith.constant 0 : index
    %c0_3 = arith.constant 0 : index
    %c0_4 = arith.constant 0 : index
    %c0_5 = arith.constant 0 : index
    %5 = vector.load %arg4[%c0_2, %c0_3, %c0_4, %c0_5] : memref<3x3x4x128xf32, #tpu.memory_space<vmem>>, vector<1x1x4x128xf32>
    %6 = vector.shape_cast %5 : vector<1x1x4x128xf32> to vector<4x128xf32>
    %cst = arith.constant dense<0.000000e+00> : vector<8x16x128xf32>
    %7 = tpu.matmul %4, %6, %cst {dimension_numbers = #tpu.dot_dimension_numbers<[2], [0], [0, 1], [1], [0, 0, 0, 1, 1, 1], [], []>} : vector<8x16x4xf32>, vector<4x128xf32>, vector<8x16x128xf32> -> vector<8x16x128xf32>
    %c0_6 = arith.constant 0 : index
    %c0_7 = arith.constant 0 : index
    %c0_8 = arith.constant 0 : index
    %8 = vector.load %arg8[%c0_6, %c0_7, %c0_8] : memref<8x16x128xf32, #tpu.memory_space<vmem>>, vector<8x16x128xf32>
    tpu.vector_store %arg8[%c0_6, %c0_7, %c0_8], %7 {strides = array<i32>} : memref<8x16x128xf32, #tpu.memory_space<vmem>>, vector<8x16x128xf32>,
    %c0_i32_9 = arith.constant 0 : i32
    %9 = arith.addi %0, %c0_i32_9 : i32
    %c0_10 = arith.constant 0 : index
    %10 = arith.index_cast %9 : i32 to index
    %c1 = arith.constant 1 : index
    %c0_11 = arith.constant 0 : index
    %11 = vector.load %arg3[%c0_10, %10, %c1, %c0_11] : memref<1x18x18x4xf32, #tpu.memory_space<vmem>>, vector<1x8x16x4xf32>
    %12 = vector.shape_cast %11 : vector<1x8x16x4xf32> to vector<8x16x4xf32>
    %c0_12 = arith.constant 0 : index
    %c1_13 = arith.constant 1 : index
    %c0_14 = arith.constant 0 : index
    %c0_15 = arith.constant 0 : index
    %13 = vector.load %arg4[%c0_12, %c1_13, %c0_14, %c0_15] : memref<3x3x4x128xf32, #tpu.memory_space<vmem>>, vector<1x1x4x128xf32>
    %14 = vector.shape_cast %13 : vector<1x1x4x128xf32> to vector<4x128xf32>
    %cst_16 = arith.constant dense<0.000000e+00> : vector<8x16x128xf32>
    %15 = tpu.matmul %12, %14, %cst_16 {dimension_numbers = #tpu.dot_dimension_numbers<[2], [0], [0, 1], [1], [0, 0, 0, 1, 1, 1], [], []>} : vector<8x16x4xf32>, vector<4x128xf32>, vector<8x16x128xf32> -> vector<8x16x128xf32>
    %c0_17 = arith.constant 0 : index
    %c0_18 = arith.constant 0 : index
    %c0_19 = arith.constant 0 : index
    %16 = vector.load %arg8[%c0_17, %c0_18, %c0_19] : memref<8x16x128xf32, #tpu.memory_space<vmem>>, vector<8x16x128xf32>
    %17 = arith.addf %16, %15 : vector<8x16x128xf32>
    %c0_20 = arith.constant 0 : index
    %c0_21 = arith.constant 0 : index
    %c0_22 = arith.constant 0 : index
    %18 = vector.load %arg8[%c0_20, %c0_21, %c0_22] : memref<8x16x128xf32, #tpu.memory_space<vmem>>, vector<8x16x128xf32>
    tpu.vector_store %arg8[%c0_20, %c0_21, %c0_22], %17 {strides = array<i32>} : memref<8x16x128xf32, #tpu.memory_space<vmem>>, vector<8x16x128xf32>,
    %c0_i32_23 = arith.constant 0 : i32
    %19 = arith.addi %0, %c0_i32_23 : i32
    %c0_24 = arith.constant 0 : index
    %20 = arith.index_cast %19 : i32 to index
    %c2 = arith.constant 2 : index
    %c0_25 = arith.constant 0 : index
    %21 = vector.load %arg3[%c0_24, %20, %c2, %c0_25] : memref<1x18x18x4xf32, #tpu.memory_space<vmem>>, vector<1x8x16x4xf32>
    %22 = vector.shape_cast %21 : vector<1x8x16x4xf32> to vector<8x16x4xf32>
    %c0_26 = arith.constant 0 : index
    %c2_27 = arith.constant 2 : index
    %c0_28 = arith.constant 0 : index
    %c0_29 = arith.constant 0 : index
    %23 = vector.load %arg4[%c0_26, %c2_27, %c0_28, %c0_29] : memref<3x3x4x128xf32, #tpu.memory_space<vmem>>, vector<1x1x4x128xf32>
    %24 = vector.shape_cast %23 : vector<1x1x4x128xf32> to vector<4x128xf32>
    %cst_30 = arith.constant dense<0.000000e+00> : vector<8x16x128xf32>
    %25 = tpu.matmul %22, %24, %cst_30 {dimension_numbers = #tpu.dot_dimension_numbers<[2], [0], [0, 1], [1], [0, 0, 0, 1, 1, 1], [], []>} : vector<8x16x4xf32>, vector<4x128xf32>, vector<8x16x128xf32> -> vector<8x16x128xf32>
    %c0_31 = arith.constant 0 : index
    %c0_32 = arith.constant 0 : index
    %c0_33 = arith.constant 0 : index
    %26 = vector.load %arg8[%c0_31, %c0_32, %c0_33] : memref<8x16x128xf32, #tpu.memory_space<vmem>>, vector<8x16x128xf32>
    %27 = arith.addf %26, %25 : vector<8x16x128xf32>
    %c0_34 = arith.constant 0 : index
    %c0_35 = arith.constant 0 : index
    %c0_36 = arith.constant 0 : index
    %28 = vector.load %arg8[%c0_34, %c0_35, %c0_36] : memref<8x16x128xf32, #tpu.memory_space<vmem>>, vector<8x16x128xf32>
    tpu.vector_store %arg8[%c0_34, %c0_35, %c0_36], %27 {strides = array<i32>} : memref<8x16x128xf32, #tpu.memory_space<vmem>>, vector<8x16x128xf32>,
    %c1_i32 = arith.constant 1 : i32
    %29 = arith.addi %0, %c1_i32 : i32
    %c0_37 = arith.constant 0 : index
    %30 = arith.index_cast %29 : i32 to index
    %c0_38 = arith.constant 0 : index
    %c0_39 = arith.constant 0 : index
    %31 = vector.load %arg3[%c0_37, %30, %c0_38, %c0_39] : memref<1x18x18x4xf32, #tpu.memory_space<vmem>>, vector<1x8x16x4xf32>
    %32 = vector.shape_cast %31 : vector<1x8x16x4xf32> to vector<8x16x4xf32>
    %c1_40 = arith.constant 1 : index
    %c0_41 = arith.constant 0 : index
    %c0_42 = arith.constant 0 : index
    %c0_43 = arith.constant 0 : index
    %33 = vector.load %arg4[%c1_40, %c0_41, %c0_42, %c0_43] : memref<3x3x4x128xf32, #tpu.memory_space<vmem>>, vector<1x1x4x128xf32>
    %34 = vector.shape_cast %33 : vector<1x1x4x128xf32> to vector<4x128xf32>
    %cst_44 = arith.constant dense<0.000000e+00> : vector<8x16x128xf32>
    %35 = tpu.matmul %32, %34, %cst_44 {dimension_numbers = #tpu.dot_dimension_numbers<[2], [0], [0, 1], [1], [0, 0, 0, 1, 1, 1], [], []>} : vector<8x16x4xf32>, vector<4x128xf32>, vector<8x16x128xf32> -> vector<8x16x128xf32>
    %c0_45 = arith.constant 0 : index
    %c0_46 = arith.constant 0 : index
    %c0_47 = arith.constant 0 : index
    %36 = vector.load %arg8[%c0_45, %c0_46, %c0_47] : memref<8x16x128xf32, #tpu.memory_space<vmem>>, vector<8x16x128xf32>
    %37 = arith.addf %36, %35 : vector<8x16x128xf32>
    %c0_48 = arith.constant 0 : index
    %c0_49 = arith.constant 0 : index
    %c0_50 = arith.constant 0 : index
    %38 = vector.load %arg8[%c0_48, %c0_49, %c0_50] : memref<8x16x128xf32, #tpu.memory_space<vmem>>, vector<8x16x128xf32>
    tpu.vector_store %arg8[%c0_48, %c0_49, %c0_50], %37 {strides = array<i32>} : memref<8x16x128xf32, #tpu.memory_space<vmem>>, vector<8x16x128xf32>,
    %c1_i32_51 = arith.constant 1 : i32
    %39 = arith.addi %0, %c1_i32_51 : i32
    %c0_52 = arith.constant 0 : index
    %40 = arith.index_cast %39 : i32 to index
    %c1_53 = arith.constant 1 : index
    %c0_54 = arith.constant 0 : index
    %41 = vector.load %arg3[%c0_52, %40, %c1_53, %c0_54] : memref<1x18x18x4xf32, #tpu.memory_space<vmem>>, vector<1x8x16x4xf32>
    %42 = vector.shape_cast %41 : vector<1x8x16x4xf32> to vector<8x16x4xf32>
    %c1_55 = arith.constant 1 : index
    %c1_56 = arith.constant 1 : index
    %c0_57 = arith.constant 0 : index
    %c0_58 = arith.constant 0 : index
    %43 = vector.load %arg4[%c1_55, %c1_56, %c0_57, %c0_58] : memref<3x3x4x128xf32, #tpu.memory_space<vmem>>, vector<1x1x4x128xf32>
    %44 = vector.shape_cast %43 : vector<1x1x4x128xf32> to vector<4x128xf32>
    %cst_59 = arith.constant dense<0.000000e+00> : vector<8x16x128xf32>
    %45 = tpu.matmul %42, %44, %cst_59 {dimension_numbers = #tpu.dot_dimension_numbers<[2], [0], [0, 1], [1], [0, 0, 0, 1, 1, 1], [], []>} : vector<8x16x4xf32>, vector<4x128xf32>, vector<8x16x128xf32> -> vector<8x16x128xf32>
    %c0_60 = arith.constant 0 : index
    %c0_61 = arith.constant 0 : index
    %c0_62 = arith.constant 0 : index
    %46 = vector.load %arg8[%c0_60, %c0_61, %c0_62] : memref<8x16x128xf32, #tpu.memory_space<vmem>>, vector<8x16x128xf32>
    %47 = arith.addf %46, %45 : vector<8x16x128xf32>
    %c0_63 = arith.constant 0 : index
    %c0_64 = arith.constant 0 : index
    %c0_65 = arith.constant 0 : index
    %48 = vector.load %arg8[%c0_63, %c0_64, %c0_65] : memref<8x16x128xf32, #tpu.memory_space<vmem>>, vector<8x16x128xf32>
    tpu.vector_store %arg8[%c0_63, %c0_64, %c0_65], %47 {strides = array<i32>} : memref<8x16x128xf32, #tpu.memory_space<vmem>>, vector<8x16x128xf32>,
    %c1_i32_66 = arith.constant 1 : i32
    %49 = arith.addi %0, %c1_i32_66 : i32
    %c0_67 = arith.constant 0 : index
    %50 = arith.index_cast %49 : i32 to index
    %c2_68 = arith.constant 2 : index
    %c0_69 = arith.constant 0 : index
    %51 = vector.load %arg3[%c0_67, %50, %c2_68, %c0_69] : memref<1x18x18x4xf32, #tpu.memory_space<vmem>>, vector<1x8x16x4xf32>
    %52 = vector.shape_cast %51 : vector<1x8x16x4xf32> to vector<8x16x4xf32>
    %c1_70 = arith.constant 1 : index
    %c2_71 = arith.constant 2 : index
    %c0_72 = arith.constant 0 : index
    %c0_73 = arith.constant 0 : index
    %53 = vector.load %arg4[%c1_70, %c2_71, %c0_72, %c0_73] : memref<3x3x4x128xf32, #tpu.memory_space<vmem>>, vector<1x1x4x128xf32>
    %54 = vector.shape_cast %53 : vector<1x1x4x128xf32> to vector<4x128xf32>
    %cst_74 = arith.constant dense<0.000000e+00> : vector<8x16x128xf32>
    %55 = tpu.matmul %52, %54, %cst_74 {dimension_numbers = #tpu.dot_dimension_numbers<[2], [0], [0, 1], [1], [0, 0, 0, 1, 1, 1], [], []>} : vector<8x16x4xf32>, vector<4x128xf32>, vector<8x16x128xf32> -> vector<8x16x128xf32>
    %c0_75 = arith.constant 0 : index
    %c0_76 = arith.constant 0 : index
    %c0_77 = arith.constant 0 : index
    %56 = vector.load %arg8[%c0_75, %c0_76, %c0_77] : memref<8x16x128xf32, #tpu.memory_space<vmem>>, vector<8x16x128xf32>
    %57 = arith.addf %56, %55 : vector<8x16x128xf32>
    %c0_78 = arith.constant 0 : index
    %c0_79 = arith.constant 0 : index
    %c0_80 = arith.constant 0 : index
    %58 = vector.load %arg8[%c0_78, %c0_79, %c0_80] : memref<8x16x128xf32, #tpu.memory_space<vmem>>, vector<8x16x128xf32>
    tpu.vector_store %arg8[%c0_78, %c0_79, %c0_80], %57 {strides = array<i32>} : memref<8x16x128xf32, #tpu.memory_space<vmem>>, vector<8x16x128xf32>,
    %c2_i32 = arith.constant 2 : i32
    %59 = arith.addi %0, %c2_i32 : i32
    %c0_81 = arith.constant 0 : index
    %60 = arith.index_cast %59 : i32 to index
    %c0_82 = arith.constant 0 : index
    %c0_83 = arith.constant 0 : index
    %61 = vector.load %arg3[%c0_81, %60, %c0_82, %c0_83] : memref<1x18x18x4xf32, #tpu.memory_space<vmem>>, vector<1x8x16x4xf32>
    %62 = vector.shape_cast %61 : vector<1x8x16x4xf32> to vector<8x16x4xf32>
    %c2_84 = arith.constant 2 : index
    %c0_85 = arith.constant 0 : index
    %c0_86 = arith.constant 0 : index
    %c0_87 = arith.constant 0 : index
    %63 = vector.load %arg4[%c2_84, %c0_85, %c0_86, %c0_87] : memref<3x3x4x128xf32, #tpu.memory_space<vmem>>, vector<1x1x4x128xf32>
    %64 = vector.shape_cast %63 : vector<1x1x4x128xf32> to vector<4x128xf32>
    %cst_88 = arith.constant dense<0.000000e+00> : vector<8x16x128xf32>
    %65 = tpu.matmul %62, %64, %cst_88 {dimension_numbers = #tpu.dot_dimension_numbers<[2], [0], [0, 1], [1], [0, 0, 0, 1, 1, 1], [], []>} : vector<8x16x4xf32>, vector<4x128xf32>, vector<8x16x128xf32> -> vector<8x16x128xf32>
    %c0_89 = arith.constant 0 : index
    %c0_90 = arith.constant 0 : index
    %c0_91 = arith.constant 0 : index
    %66 = vector.load %arg8[%c0_89, %c0_90, %c0_91] : memref<8x16x128xf32, #tpu.memory_space<vmem>>, vector<8x16x128xf32>
    %67 = arith.addf %66, %65 : vector<8x16x128xf32>
    %c0_92 = arith.constant 0 : index
    %c0_93 = arith.constant 0 : index
    %c0_94 = arith.constant 0 : index
    %68 = vector.load %arg8[%c0_92, %c0_93, %c0_94] : memref<8x16x128xf32, #tpu.memory_space<vmem>>, vector<8x16x128xf32>
    tpu.vector_store %arg8[%c0_92, %c0_93, %c0_94], %67 {strides = array<i32>} : memref<8x16x128xf32, #tpu.memory_space<vmem>>, vector<8x16x128xf32>,
    %c2_i32_95 = arith.constant 2 : i32
    %69 = arith.addi %0, %c2_i32_95 : i32
    %c0_96 = arith.constant 0 : index
    %70 = arith.index_cast %69 : i32 to index
    %c1_97 = arith.constant 1 : index
    %c0_98 = arith.constant 0 : index
    %71 = vector.load %arg3[%c0_96, %70, %c1_97, %c0_98] : memref<1x18x18x4xf32, #tpu.memory_space<vmem>>, vector<1x8x16x4xf32>
    %72 = vector.shape_cast %71 : vector<1x8x16x4xf32> to vector<8x16x4xf32>
    %c2_99 = arith.constant 2 : index
    %c1_100 = arith.constant 1 : index
    %c0_101 = arith.constant 0 : index
    %c0_102 = arith.constant 0 : index
    %73 = vector.load %arg4[%c2_99, %c1_100, %c0_101, %c0_102] : memref<3x3x4x128xf32, #tpu.memory_space<vmem>>, vector<1x1x4x128xf32>
    %74 = vector.shape_cast %73 : vector<1x1x4x128xf32> to vector<4x128xf32>
    %cst_103 = arith.constant dense<0.000000e+00> : vector<8x16x128xf32>
    %75 = tpu.matmul %72, %74, %cst_103 {dimension_numbers = #tpu.dot_dimension_numbers<[2], [0], [0, 1], [1], [0, 0, 0, 1, 1, 1], [], []>} : vector<8x16x4xf32>, vector<4x128xf32>, vector<8x16x128xf32> -> vector<8x16x128xf32>
    %c0_104 = arith.constant 0 : index
    %c0_105 = arith.constant 0 : index
    %c0_106 = arith.constant 0 : index
    %76 = vector.load %arg8[%c0_104, %c0_105, %c0_106] : memref<8x16x128xf32, #tpu.memory_space<vmem>>, vector<8x16x128xf32>
    %77 = arith.addf %76, %75 : vector<8x16x128xf32>
    %c0_107 = arith.constant 0 : index
    %c0_108 = arith.constant 0 : index
    %c0_109 = arith.constant 0 : index
    %78 = vector.load %arg8[%c0_107, %c0_108, %c0_109] : memref<8x16x128xf32, #tpu.memory_space<vmem>>, vector<8x16x128xf32>
    tpu.vector_store %arg8[%c0_107, %c0_108, %c0_109], %77 {strides = array<i32>} : memref<8x16x128xf32, #tpu.memory_space<vmem>>, vector<8x16x128xf32>,
    %c2_i32_110 = arith.constant 2 : i32
    %79 = arith.addi %0, %c2_i32_110 : i32
    %c0_111 = arith.constant 0 : index
    %80 = arith.index_cast %79 : i32 to index
    %c2_112 = arith.constant 2 : index
    %c0_113 = arith.constant 0 : index
    %81 = vector.load %arg3[%c0_111, %80, %c2_112, %c0_113] : memref<1x18x18x4xf32, #tpu.memory_space<vmem>>, vector<1x8x16x4xf32>
    %82 = vector.shape_cast %81 : vector<1x8x16x4xf32> to vector<8x16x4xf32>
    %c2_114 = arith.constant 2 : index
    %c2_115 = arith.constant 2 : index
    %c0_116 = arith.constant 0 : index
    %c0_117 = arith.constant 0 : index
    %83 = vector.load %arg4[%c2_114, %c2_115, %c0_116, %c0_117] : memref<3x3x4x128xf32, #tpu.memory_space<vmem>>, vector<1x1x4x128xf32>
    %84 = vector.shape_cast %83 : vector<1x1x4x128xf32> to vector<4x128xf32>
    %cst_118 = arith.constant dense<0.000000e+00> : vector<8x16x128xf32>
    %85 = tpu.matmul %82, %84, %cst_118 {dimension_numbers = #tpu.dot_dimension_numbers<[2], [0], [0, 1], [1], [0, 0, 0, 1, 1, 1], [], []>} : vector<8x16x4xf32>, vector<4x128xf32>, vector<8x16x128xf32> -> vector<8x16x128xf32>
    %c0_119 = arith.constant 0 : index
    %c0_120 = arith.constant 0 : index
    %c0_121 = arith.constant 0 : index
    %86 = vector.load %arg8[%c0_119, %c0_120, %c0_121] : memref<8x16x128xf32, #tpu.memory_space<vmem>>, vector<8x16x128xf32>
    %87 = arith.addf %86, %85 : vector<8x16x128xf32>
    %c0_122 = arith.constant 0 : index
    %c0_123 = arith.constant 0 : index
    %c0_124 = arith.constant 0 : index
    %88 = vector.load %arg8[%c0_122, %c0_123, %c0_124] : memref<8x16x128xf32, #tpu.memory_space<vmem>>, vector<8x16x128xf32>
    tpu.vector_store %arg8[%c0_122, %c0_123, %c0_124], %87 {strides = array<i32>} : memref<8x16x128xf32, #tpu.memory_space<vmem>>, vector<8x16x128xf32>,
    %c0_125 = arith.constant 0 : index
    %c0_126 = arith.constant 0 : index
    %c0_127 = arith.constant 0 : index
    %89 = vector.load %arg8[%c0_125, %c0_126, %c0_127] : memref<8x16x128xf32, #tpu.memory_space<vmem>>, vector<8x16x128xf32>
    %c0_128 = arith.constant 0 : index
    %c0_129 = arith.constant 0 : index
    %90 = vector.load %arg5[%c0_128, %c0_129] : memref<1x128xf32, #tpu.memory_space<vmem>>, vector<1x128xf32>
    %91 = vector.shape_cast %90 : vector<1x128xf32> to vector<1x1x128xf32>
    %92 = vector.broadcast %91 : vector<1x1x128xf32> to vector<8x16x128xf32>
    %93 = arith.mulf %89, %92 : vector<8x16x128xf32>
    %c0_130 = arith.constant 0 : index
    %c0_131 = arith.constant 0 : index
    %94 = vector.load %arg6[%c0_130, %c0_131] : memref<1x128xf32, #tpu.memory_space<vmem>>, vector<1x128xf32>
    %95 = vector.shape_cast %94 : vector<1x128xf32> to vector<1x1x128xf32>
    %96 = vector.broadcast %95 : vector<1x1x128xf32> to vector<8x16x128xf32>
    %97 = arith.addf %93, %96 : vector<8x16x128xf32>
    %cst_132 = arith.constant 0.000000e+00 : f32
    %98 = vector.broadcast %cst_132 : f32 to vector<8x16x128xf32>
    %99 = arith.maximumf %97, %98 : vector<8x16x128xf32>
    %c0_133 = arith.constant 0 : index
    %c0_134 = arith.constant 0 : index
    %c0_135 = arith.constant 0 : index
    %c0_136 = arith.constant 0 : index
    %100 = vector.load %arg7[%c0_133, %c0_134, %c0_135, %c0_136] : memref<1x8x16x128xf32, #tpu.memory_space<vmem>>, vector<1x8x16x128xf32>
    %101 = vector.shape_cast %100 : vector<1x8x16x128xf32> to vector<8x16x128xf32>
    %102 = vector.shape_cast %99 : vector<8x16x128xf32> to vector<1x8x16x128xf32>
    tpu.vector_store %arg7[%c0_133, %c0_134, %c0_135, %c0_136], %102 {strides = array<i32>} : memref<1x8x16x128xf32, #tpu.memory_space<vmem>>, vector<1x8x16x128xf32>,
    return
  }
  func.func @transform_0(%arg0: i32, %arg1: i32, %arg2: i32) -> (i32, i32, i32, i32) {
    %c0_i32 = arith.constant 0 : i32
    %c0_i32_0 = arith.constant 0 : i32
    %c0_i32_1 = arith.constant 0 : i32
    %c0_i32_2 = arith.constant 0 : i32
    return %arg0, %c0_i32, %c0_i32_0, %c0_i32_1 : i32, i32, i32, i32
  }
  func.func @transform_1(%arg0: i32, %arg1: i32, %arg2: i32) -> (i32, i32, i32, i32) {
    %c0_i32 = arith.constant 0 : i32
    %c0_i32_0 = arith.constant 0 : i32
    %c0_i32_1 = arith.constant 0 : i32
    %c0_i32_2 = arith.constant 0 : i32
    return %c0_i32, %c0_i32_0, %c0_i32_1, %arg1 : i32, i32, i32, i32
  }
  func.func @transform_2(%arg0: i32, %arg1: i32, %arg2: i32) -> (i32, i32) {
    %c0_i32 = arith.constant 0 : i32
    %c0_i32_0 = arith.constant 0 : i32
    return %c0_i32, %arg1 : i32, i32
  }
  func.func @transform_3(%arg0: i32, %arg1: i32, %arg2: i32) -> (i32, i32) {
    %c0_i32 = arith.constant 0 : i32
    %c0_i32_0 = arith.constant 0 : i32
    return %c0_i32, %arg1 : i32, i32
  }
  func.func @transform_4(%arg0: i32, %arg1: i32, %arg2: i32) -> (i32, i32, i32, i32) {
    %c0_i32 = arith.constant 0 : i32
    %c0_i32_0 = arith.constant 0 : i32
    return %arg0, %arg2, %c0_i32, %arg1 : i32, i32, i32, i32
  }
}

</mosaic_0001>

<bundles_post_ra>
// kernel: tpu_custom_call.1
= control target key start
LH: loop header
LB: loop body
LE: loop exit
PB: predicated region body
PF: predicated region fallthrough
CT: control target
= control target key end

     0   :  { %9 = vsyncpa [#allocation4], 0  ;;  %s4523_s0 = inlined_call_operand.vmem [shape: f32[2,18,18,4], index: 0, kind: input, shape index: {}]   ;;  %s4524_s1 = inlined_call_operand.vmem [shape: f32[3,3,4,128], index: 1, kind: input, shape index: {}]   ;;  %s4525_s2 = inlined_call_operand.vmem [shape: f32[1,128], index: 2, kind: input, shape index: {}]   ;;  %s4526_s3 = inlined_call_operand.vmem [shape: f32[1,128], index: 3, kind: input, shape index: {}]   ;;  %s4527_s4 = inlined_call_operand.hbm [shape: f32[2,16,16,128], index: 4, kind: output, shape index: {}]  }
   0x1   :  { %11 = vsyncpa [#allocation4 + $0x1], 0  ;;  %s3840_s15 = smov 0   ;;  %s3842_s16 = smov 0  }
   0x2   :  { %s3844_s17 = smov 0   ;;  %s3846_s18 = smov 0  }
   0x3   :  { %s3848_s19 = smov 0   ;;  %s3850_s20 = smov 0  }
   0x4   :  { %s3852_s21 = smov 0   ;;  %s3854_s22 = smov 0  }
   0x5 LB: > { %s2842_s23 = sadd.s32 4294967295, %s3810_s22   ;;  %s2843_s24 = sadd.s32 4294967294, %s3810_s22   ;;  %s3810_s22 = sphi %s3854_s22, %s17_s22   ;;  %s3806_s21 = sphi %s3852_s21, %s4536_s21   ;;  %s3802_s20 = sphi %s3850_s20, %s4535_s20   ;;  %s3798_s19 = sphi %s3848_s19, %s4534_s19   ;;  %s3794_s18 = sphi %s3846_s18, %s4533_s18   ;;  %s3790_s17 = sphi %s3844_s17, %s4532_s17   ;;  %s3786_s16 = sphi %s3842_s16, %s4531_s16   ;;  %s3782_s15 = sphi %s3840_s15, %s4530_s15  }
   0x6   : > { %s29_s25 = sadd.s32 1, %s3802_s20  ;;  %s36_s26 = sadd.s32 1, %s3806_s21 }
   0x7   : > { %p30_p0 = scmp.ge.s32.totalorder %s29_s25, 2  ;;  %p161_p1 = scmp.ne.s32.totalorder %s3790_s17, %s3786_s16 }
   0x8   : > { %p162_p2 = scmp.eq.s32.totalorder %s2842_s23, 3  ;;  %p167_p5 = scmp.ne.s32.totalorder %s3786_s16, %s3782_s15 }
   0x9   : > { %s4538_s25 = smov (%p30_p0, %s29_s25), 0  ;;  %s4540_s26 = smov (!%p30_p0, %s36_s26), %s3806_s21 }
   0xa   : > { %s145_s27 = ssub.s32 %s3802_s20, %s4538_s25  ;;  %p3891_p3 = por %p162_p2, %p161_p1 }
   0xb   : > { %p38_p4 = scmp.ge.s32.totalorder %s4540_s26, 2  ;;  %p168_p6 = scmp.eq.s32.totalorder %s2843_s24, 3 }
   0xc   : > { %p2849_p7 = scmp.ge.s32.totalorder %s3810_s22, 1  ;;  %p213_p9 = scmp.lt.s32.totalorder %s3810_s22, 5 }
   0xd   : > { %s4542_s26 = smov (%p38_p4, %s4540_s26), 0  ;;  %p3900_p8 = por %p168_p6, %p167_p5 }
   0xe   : > { %s144_s30 = ssub.s32 %s3806_s21, %s4542_s26  ;;  %s151_s5 = sadd.s32 1, %s3790_s17 }
   0xf   : > { %s146_s6 = sor.u32 %s145_s27, %s144_s30  ;;  %p214_p10 = pnand %p2849_p7, %p213_p9 }
  0x10   : > { %p149_p11 = scmp.eq.s32.totalorder %s146_s6, 0  ;;  %v284_v0 = vld [vmem:[%s4524_s1] sm:$0xf] (!%p214_p10)  ;;  %vm334_vm0 = vcmask (!%p214_p10), 1043456   ;;  %v3917_v1 = vld [vmem:[%s4524_s1 + $0x10] sm:$0xf] (!%p214_p10) }
  0x11   : > { %217 = sbr.rel (%p214_p10) target bundleno = 409 (0x199), region = 36  ;;  %p249_p12 = scmp.lt.s32.totalorder (!%p214_p10), %s3798_s19, 1  ;;  %3278 = vmatprep.subr.msk.mxu1 (!%p214_p10), %vm334_vm0, %v284_v0  ;;  %3382 = vmatprep.subr.msk.mxu0 (!%p214_p10), %vm334_vm0, %v3917_v1  ;;  %v2871_v2 = vld [vmem:[%s4524_s1 + $0x4] sm:$0xf] (!%p214_p10)  ;;  %v2993_v3 = vld [vmem:[%s4524_s1 + $0x14] sm:$0xf] (!%p214_p10) }
  0x12   : > { %s3909_s7 = scalar_select %p149_p11, %s3790_s17, %s151_s5  }
  0x13   : > { %3279 = vmatpush3.msk.msra.mxu1 (!%p214_p10), %vm334_vm0, %v284_v0  ;;  %3383 = vmatpush3.msk.msra.mxu0 (!%p214_p10), %vm334_vm0, %v3917_v1  ;;  %s2853_s27 = smul.u32 (!%p214_p10), 192, %s3794_s18  ;;  %vm285_vm1 = vcmask (!%p214_p10), 31744   ;;  %v3029_v10 = vld [vmem:[%s4524_s1 + $0x18] sm:$0xf] (!%p214_p10)  ;;  %v3967_v11 = vld [vmem:[%s4524_s1 + $0x8] sm:$0xf] (!%p214_p10) }
  0x14   : > { %3304 = vmatprep.subr.msk.mxu1 (!%p214_p10), %vm334_vm0, %v2871_v2  ;;  %3408 = vmatprep.subr.msk.mxu0 (!%p214_p10), %vm334_vm0, %v2993_v3  ;;  %v3063_v28 = vld [vmem:[%s4524_s1 + $0x1c] sm:$0xf] (!%p214_p10)  ;;  %v2925_v44 = vld [vmem:[%s4524_s1 + $0xc] sm:$0xf] (!%p214_p10)  ;;  %v3097_v51 = vld [vmem:[%s4524_s1 + $0x20] sm:$0xf] (!%p214_p10) }
  0x15   : > { %s246_s6 = sand.u32 (!%p214_p10), 1, %s3786_s16   ;;  %s3124_s14 = sshll.u32 (!%p214_p10), %s3794_s18, 4 }
  0x16   : > { %s2850_s12 = sshll.u32 (!%p214_p10), %s246_s6, 7  ;;  %s3120_s23 = sshll.u32 (!%p214_p10), %s3798_s19, 5 }
  0x17   : > { %s4415_s13 = scalar_lea.vmem (!%p214_p10), [#allocation3], %s2850_s12 }
  0x18   : > { %s250_s24 = scalar_select %p249_p12, %s3798_s19, 1 }
  0x19   : > { %s2713_s19 = sshll.u32 %s4415_s13, 4  ;;  %s4465_s19 = int_to_ptr.vmem [resolvable:$true] %s2713_s19 }
  0x1a   : > { %s3642_s30 = smul.u32 432, %s250_s24  ;;  %s2710_s24 = sadd.s32 %s3124_s14, %s3120_s23 }
  0x1b   : > { %s3121_s18 = sshll.u32 %s2710_s24, 7  ;;  %s3716_s10 = scalar_lea.vmem %s4465_s19, 2048 }
  0x1c   : > { %s253_s8 = scalar_lea.vmem %s4523_s0, %s3642_s30  ;;  %s4463_s5 = scalar_lea.hbm %s4527_s4, %s3121_s18 }
  0x1d   : > { %s3939_s9 = scalar_lea.vmem %s253_s8, %s2853_s27  ;;  %s4471_s8 = scalar_lea.sflag [#allocation4], %s246_s6 }
  0x1e   : > { %v268_v4 = vld [vmem:[%s3939_s9] sm:$0xff]  ;;  %v269_v6 = vld [vmem:[%s3939_s9 + $0x8] sm:$0xff]  ;;  %v3953_v8 = vld [vmem:[%s3939_s9 + $0x18] sm:$0xff]  ;;  %p3717_p13 = scmp.ne.s32.totalorder %s4465_s19, %s3716_s10 }
  0x1f   : > { %v3943_v5 = vld [vmem:[%s3939_s9 + $0x19] sm:$0xff]  ;;  %3280 = vmatprep.mubr.msk.f32.mxu1 %vm285_vm1, %v268_v4  ;;  %v3950_v7 = vld [vmem:[%s3939_s9 + $0x21] sm:$0xff]  ;;  %v3956_v9 = vld [vmem:[%s3939_s9 + $0x31] sm:$0xff] }
  0x20   : > { %3384 = vmatprep.mubr.msk.f32.mxu0 %vm285_vm1, %v3943_v5  ;;  %3281 = vmatmul.mubr.msk.f32.vlgmr.msra.gmra.mrb[0].mxu1 %vm285_vm1, %v269_v6  ;;  %v3972_v12 = vld [vmem:[%s3939_s9 + $0x20] sm:$0xff]  ;;  %v3982_v14 = vld [vmem:[%s3939_s9 + $0x30] sm:$0xff]  ;;  %v3999_v16 = vld [vmem:[%s3939_s9 + $0x38] sm:$0xff]  ;;  %p3718_p0 = pnand %p3717_p13, %p3891_p3 }
  0x21   : > { %3385 = vmatmul.mubr.msk.f32.vlgmr.msra.gmra.mrb[0].mxu0 %vm285_vm1, %v3950_v7  ;;  %3305 = vmatpush3.msk.msra.mxu1 %vm334_vm0, %v2871_v2  ;;  %v3975_v13 = vld [vmem:[%s3939_s9 + $0x39] sm:$0xff]  ;;  %v3985_v15 = vld [vmem:[%s3939_s9 + $0x49] sm:$0xff]  ;;  %v4002_v17 = vld [vmem:[%s3939_s9 + $0x51] sm:$0xff] }
  0x22   : > { %3409 = vmatpush3.msk.msra.mxu0 %vm334_vm0, %v2993_v3  ;;  %3283 = vmatprep.mubr.msk.f32.mxu1 %vm285_vm1, %v3953_v8  ;;  %v4005_v18 = vld [vmem:[%s3939_s9 + $0x48] sm:$0xff]  ;;  %v4019_v20 = vld [vmem:[%s3939_s9 + $0x50] sm:$0xff]  ;;  %v4025_v22 = vld [vmem:[%s3939_s9 + $0x60] sm:$0xff]  ;;  %p3719_p1 = pneg %p3718_p0 }
  0x23   : > { %3387 = vmatprep.mubr.msk.f32.mxu0 %vm285_vm1, %v3956_v9  ;;  %3434 = vmatprep.subr.msk.mxu0 %vm334_vm0, %v3029_v10  ;;  %v4008_v19 = vld [vmem:[%s3939_s9 + $0x61] sm:$0xff]  ;;  %v4022_v21 = vld [vmem:[%s3939_s9 + $0x69] sm:$0xff]  ;;  %v4045_v26 = vld [vmem:[%s3939_s9 + $0x78] sm:$0xff] }
  0x24   : > { %3330 = vmatprep.subr.msk.mxu1 %vm334_vm0, %v3967_v11  ;;  %3284 = vmatmul.mubr.msk.f32.gmra.mrb[2].mxu1 %vm285_vm1, %v3972_v12  ;;  %v4028_v23 = vld [vmem:[%s3939_s9 + $0x1a] sm:$0xff]  ;;  %v4039_v24 = vld [vmem:[%s3939_s9 + $0x68] sm:$0xff]  ;;  %v4048_v27 = vld [vmem:[%s3939_s9 + $0x32] sm:$0xff] }
  0x25   : > { %3388 = vmatmul.mubr.msk.f32.gmra.mrb[2].mxu0 %vm285_vm1, %v3975_v13  ;;  %3286 = vmatprep.mubr.msk.f32.mxu1 %vm285_vm1, %v3982_v14  ;;  %v4042_v25 = vld [vmem:[%s3939_s9 + $0x22] sm:$0xff]  ;;  %v4064_v30 = vld [vmem:[%s3939_s9 + $0x3a] sm:$0xff]  ;;  %v4069_v31 = vld [vmem:[%s3939_s9 + $0x90] sm:$0xff] }
  0x26   : > { %3390 = vmatprep.mubr.msk.f32.mxu0 %vm285_vm1, %v3985_v15  ;;  %v4061_v29 = vld [vmem:[%s3939_s9 + $0x80] sm:$0xff]  ;;  %v4072_v32 = vld [vmem:[%s3939_s9 + $0x4a] sm:$0xff]  ;;  %v4084_v33 = vld [vmem:[%s3939_s9 + $0x98] sm:$0xff] }
  0x27   : > { %v4087_v34 = vld [vmem:[%s3939_s9 + $0x52] sm:$0xff]  ;;  %v4090_v35 = vld [vmem:[%s3939_s9 + $0xa8] sm:$0xff]  ;;  %v4111_v40 = vld [vmem:[%s3939_s9 + $0x7a] sm:$0xff] }
  0x28   : > { %3287 = vmatmul.mubr.msk.f32.gmra.mrb[4].mxu1 %vm285_vm1, %v3999_v16  ;;  %v4093_v36 = vld [vmem:[%s3939_s9 + $0x62] sm:$0xff]  ;;  %v4104_v37 = vld [vmem:[%s3939_s9 + $0xb0] sm:$0xff]  ;;  %v4138_v45 = vld [vmem:[%s3939_s9 + $0x9a] sm:$0xff] }
  0x29   : > { %3391 = vmatmul.mubr.msk.f32.gmra.mrb[4].mxu0 %vm285_vm1, %v4002_v17  ;;  %3289 = vmatprep.mubr.msk.f32.mxu1 %vm285_vm1, %v4005_v18  ;;  %v4107_v38 = vld [vmem:[%s3939_s9 + $0x6a] sm:$0xff]  ;;  %v499_v39 = vld [vmem:[%s3939_s9 + $0x1] sm:$0xff]  ;;  %v4125_v43 = vld [vmem:[%s3939_s9 + $0x92] sm:$0xff] }
  0x2a   : > { %3393 = vmatprep.mubr.msk.f32.mxu0 %vm285_vm1, %v4008_v19  ;;  %v500_v41 = vld [vmem:[%s3939_s9 + $0x9] sm:$0xff]  ;;  %v4155_v47 = vld [vmem:[%s3939_s9 + $0xb2] sm:$0xff]  ;;  %v4193_v52 = vld [vmem:[%s3939_s9 + $0x81] sm:$0xff] }
  0x2b   : > { %v4122_v42 = vld [vmem:[%s3939_s9 + $0x82] sm:$0xff]  ;;  %v4143_v46 = vld [vmem:[%s3939_s9 + $0xaa] sm:$0xff]  ;;  %v4180_v50 = vld [vmem:[%s3939_s9 + $0x79] sm:$0xff] }
  0x2c   : > { %3290 = vmatmul.mubr.msk.f32.gmra.mrb[6].mxu1 %vm285_vm1, %v4019_v20  ;;  %v4158_v48 = vld [vmem:[%s3939_s9 + $0xc2] sm:$0xff]  ;;  %v4169_v49 = vld [vmem:[%s3939_s9 + $0xca] sm:$0xff]  ;;  %v4210_v54 = vld [vmem:[%s3939_s9 + $0x99] sm:$0xff] }
  0x2d   : > { %3394 = vmatmul.mubr.msk.f32.gmra.mrb[6].mxu0 %vm285_vm1, %v4022_v21  ;;  %3292 = vmatprep.mubr.msk.f32.mxu1 %vm285_vm1, %v4025_v22  ;;  %v4198_v53 = vld [vmem:[%s3939_s9 + $0x91] sm:$0xff]  ;;  %v4213_v55 = vld [vmem:[%s3939_s9 + $0xa9] sm:$0xff]  ;;  %v4244_v59 = vld [vmem:[%s3939_s9 + $0xc0] sm:$0xff] }
  0x2e   : > { %3410 = vmatprep.mubr.msk.f32.mxu0 %vm285_vm1, %v4028_v23  ;;  %v4224_v56 = vld [vmem:[%s3939_s9 + $0xb1] sm:$0xff]  ;;  %v761_v57 = vld [vmem:[%s3939_s9 + $0x2] sm:$0xff]  ;;  %v3095_v3 = vld [vmem:[%s3939_s9 + $0xda] sm:$0xff] }
  0x2f   : > { %v762_v58 = vld [vmem:[%s3939_s9 + $0xa] sm:$0xff]  ;;  %v3027_v61 = vld [vmem:[%s3939_s9 + $0xd8] sm:$0xff]  ;;  %v3028_v62 = vld [vmem:[%s3939_s9 + $0xe0] sm:$0xff] }
  0x30   : > { %3293 = vmatmul.mubr.msk.f32.gmra.mrb[8].mxu1 %vm285_vm1, %v4039_v24  ;;  %v3026_v60 = vld [vmem:[%s3939_s9 + $0xc8] sm:$0xff] }
  0x31   : > { %3411 = vmatmul.mubr.msk.f32.vlgmr.msra.gmra.mrb[0].mxu0 %vm285_vm1, %v4042_v25  ;;  %3295 = vmatprep.mubr.msk.f32.mxu1 %vm285_vm1, %v4045_v26  ;;  %v3059_v63 = vld [vmem:[%s3939_s9 + $0xc1] sm:$0xff]  ;;  %v3060_v0 = vld [vmem:[%s3939_s9 + $0xc9] sm:$0xff] }
  0x32   : > { %3435 = vmatpush3.msk.msra.mxu0 %vm334_vm0, %v3029_v10  ;;  %3413 = vmatprep.mubr.msk.f32.mxu0 %vm285_vm1, %v4048_v27  ;;  %v3062_v2 = vld [vmem:[%s3939_s9 + $0xe1] sm:$0xff] }
  0x33   : > { %3460 = vmatprep.subr.msk.mxu0 %vm334_vm0, %v3063_v28  ;;  %v3096_v4 = vld [vmem:[%s3939_s9 + $0xe2] sm:$0xff] }
  0x34   : > { %3296 = vmatmul.mubr.msk.f32.gmra.mrb[10].mxu1 %vm285_vm1, %v4061_v29 }
  0x35   : > { %3414 = vmatmul.mubr.msk.f32.gmra.mrb[2].mxu0 %vm285_vm1, %v4064_v30  ;;  %3298 = vmatprep.mubr.msk.f32.mxu1 %vm285_vm1, %v4069_v31 }
  0x36   : > { %3416 = vmatprep.mubr.msk.f32.mxu0 %vm285_vm1, %v4072_v32 }
  0x38   : > { %3299 = vmatmul.mubr.msk.f32.gmra.mrb[12].mxu1 %vm285_vm1, %v4084_v33 }
  0x39   : > { %3417 = vmatmul.mubr.msk.f32.gmra.mrb[4].mxu0 %vm285_vm1, %v4087_v34  ;;  %3301 = vmatprep.mubr.msk.f32.mxu1 %vm285_vm1, %v4090_v35 }
  0x3a   : > { %3419 = vmatprep.mubr.msk.f32.mxu0 %vm285_vm1, %v4093_v36 }
  0x3c   : > { %3302 = vmatmul.mubr.msk.f32.gmra.mrb[14].mxu1 %vm285_vm1, %v4104_v37 }
  0x3d   : > { %3420 = vmatmul.mubr.msk.f32.gmra.mrb[6].mxu0 %vm285_vm1, %v4107_v38  ;;  %3306 = vmatprep.mubr.msk.f32.mxu1 %vm285_vm1, %v499_v39 }
  0x3e   : > { %3422 = vmatprep.mubr.msk.f32.mxu0 %vm285_vm1, %v4111_v40 }
  0x40   : > { %3307 = vmatmul.mubr.msk.f32.vlgmr.msra.gmra.mrb[0].mxu1 %vm285_vm1, %v500_v41 }
  0x41   : > { %3423 = vmatmul.mubr.msk.f32.gmra.mrb[8].mxu0 %vm285_vm1, %v4122_v42  ;;  %3331 = vmatpush3.msk.msra.mxu1 %vm334_vm0, %v3967_v11 }
  0x42   : > { %3309 = vmatprep.mubr.msk.f32.mxu1 %vm285_vm1, %v3943_v5  ;;  %3425 = vmatprep.mubr.msk.f32.mxu0 %vm285_vm1, %v4125_v43 }
  0x43   : > { %3356 = vmatprep.subr.msk.mxu1 %vm334_vm0, %v2925_v44 }
  0x44   : > { %3310 = vmatmul.mubr.msk.f32.gmra.mrb[2].mxu1 %vm285_vm1, %v3950_v7 }
  0x45   : > { %3426 = vmatmul.mubr.msk.f32.gmra.mrb[10].mxu0 %vm285_vm1, %v4138_v45  ;;  %3312 = vmatprep.mubr.msk.f32.mxu1 %vm285_vm1, %v3956_v9 }
  0x46   : > { %3428 = vmatprep.mubr.msk.f32.mxu0 %vm285_vm1, %v4143_v46 }
  0x48   : > { %3313 = vmatmul.mubr.msk.f32.gmra.mrb[4].mxu1 %vm285_vm1, %v3975_v13 }
  0x49   : > { %3429 = vmatmul.mubr.msk.f32.gmra.mrb[12].mxu0 %vm285_vm1, %v4155_v47  ;;  %3315 = vmatprep.mubr.msk.f32.mxu1 %vm285_vm1, %v3985_v15 }
  0x4a   : > { %3431 = vmatprep.mubr.msk.f32.mxu0 %vm285_vm1, %v4158_v48 }
  0x4c   : > { %3316 = vmatmul.mubr.msk.f32.gmra.mrb[6].mxu1 %vm285_vm1, %v4002_v17 }
  0x4d   : > { %3432 = vmatmul.mubr.msk.f32.gmra.mrb[14].mxu0 %vm285_vm1, %v4169_v49  ;;  %3318 = vmatprep.mubr.msk.f32.mxu1 %vm285_vm1, %v4008_v19 }
  0x4e   : > { %3436 = vmatprep.mubr.msk.f32.mxu0 %vm285_vm1, %v3982_v14 }
  0x50   : > { %3319 = vmatmul.mubr.msk.f32.gmra.mrb[8].mxu1 %vm285_vm1, %v4022_v21 }
  0x51   : > { %3437 = vmatmul.mubr.msk.f32.vlgmr.msra.gmra.mrb[0].mxu0 %vm285_vm1, %v3999_v16  ;;  %3321 = vmatprep.mubr.msk.f32.mxu1 %vm285_vm1, %v4180_v50 }
  0x52   : > { %3461 = vmatpush3.msk.msra.mxu0 %vm334_vm0, %v3063_v28  ;;  %3439 = vmatprep.mubr.msk.f32.mxu0 %vm285_vm1, %v4005_v18 }
  0x53   : > { %3486 = vmatprep.subr.msk.mxu0 %vm334_vm0, %v3097_v51 }
  0x54   : > { %3322 = vmatmul.mubr.msk.f32.gmra.mrb[10].mxu1 %vm285_vm1, %v4193_v52 }
  0x55   : > { %3440 = vmatmul.mubr.msk.f32.gmra.mrb[2].mxu0 %vm285_vm1, %v4019_v20  ;;  %3324 = vmatprep.mubr.msk.f32.mxu1 %vm285_vm1, %v4198_v53 }
  0x56   : > { %3442 = vmatprep.mubr.msk.f32.mxu0 %vm285_vm1, %v4025_v22 }
  0x58   : > { %3325 = vmatmul.mubr.msk.f32.gmra.mrb[12].mxu1 %vm285_vm1, %v4210_v54 }
  0x59   : > { %3443 = vmatmul.mubr.msk.f32.gmra.mrb[4].mxu0 %vm285_vm1, %v4039_v24  ;;  %3327 = vmatprep.mubr.msk.f32.mxu1 %vm285_vm1, %v4213_v55 }
  0x5a   : > { %3445 = vmatprep.mubr.msk.f32.mxu0 %vm285_vm1, %v4045_v26 }
  0x5c   : > { %3328 = vmatmul.mubr.msk.f32.gmra.mrb[14].mxu1 %vm285_vm1, %v4224_v56 }
  0x5d   : > { %3446 = vmatmul.mubr.msk.f32.gmra.mrb[6].mxu0 %vm285_vm1, %v4061_v29  ;;  %3332 = vmatprep.mubr.msk.f32.mxu1 %vm285_vm1, %v761_v57 }
  0x5e   : > { %3448 = vmatprep.mubr.msk.f32.mxu0 %vm285_vm1, %v4069_v31 }
  0x60   : > { %3333 = vmatmul.mubr.msk.f32.vlgmr.msra.gmra.mrb[0].mxu1 %vm285_vm1, %v762_v58 }
  0x61   : > { %3449 = vmatmul.mubr.msk.f32.gmra.mrb[8].mxu0 %vm285_vm1, %v4084_v33  ;;  %3357 = vmatpush3.msk.msra.mxu1 %vm334_vm0, %v2925_v44 }
  0x62   : > { %3335 = vmatprep.mubr.msk.f32.mxu1 %vm285_vm1, %v4028_v23  ;;  %3451 = vmatprep.mubr.msk.f32.mxu0 %vm285_vm1, %v4090_v35 }
  0x63   : > { %3512 = vmatprep.subr.msk.mxu1 %vm334_vm0, %v3917_v1 }
  0x64   : > { %3336 = vmatmul.mubr.msk.f32.gmra.mrb[2].mxu1 %vm285_vm1, %v4042_v25 }
  0x65   : > { %3452 = vmatmul.mubr.msk.f32.gmra.mrb[10].mxu0 %vm285_vm1, %v4104_v37  ;;  %3338 = vmatprep.mubr.msk.f32.mxu1 %vm285_vm1, %v4048_v27 }
  0x66   : > { %3454 = vmatprep.mubr.msk.f32.mxu0 %vm285_vm1, %v4244_v59 }
  0x68   : > { %3339 = vmatmul.mubr.msk.f32.gmra.mrb[4].mxu1 %vm285_vm1, %v4064_v30 }
  0x69   : > { %3455 = vmatmul.mubr.msk.f32.gmra.mrb[12].mxu0 %vm285_vm1, %v3026_v60  ;;  %3341 = vmatprep.mubr.msk.f32.mxu1 %vm285_vm1, %v4072_v32 }
  0x6a   : > { %3457 = vmatprep.mubr.msk.f32.mxu0 %vm285_vm1, %v3027_v61 }
  0x6c   : > { %3342 = vmatmul.mubr.msk.f32.gmra.mrb[6].mxu1 %vm285_vm1, %v4087_v34 }
  0x6d   : > { %3458 = vmatmul.mubr.msk.f32.gmra.mrb[14].mxu0 %vm285_vm1, %v3028_v62  ;;  %3344 = vmatprep.mubr.msk.f32.mxu1 %vm285_vm1, %v4093_v36 }
  0x6e   : > { %3462 = vmatprep.mubr.msk.f32.mxu0 %vm285_vm1, %v3956_v9 }
  0x70   : > { %3345 = vmatmul.mubr.msk.f32.gmra.mrb[8].mxu1 %vm285_vm1, %v4107_v38 }
  0x71   : > { %3463 = vmatmul.mubr.msk.f32.vlgmr.msra.gmra.mrb[0].mxu0 %vm285_vm1, %v3975_v13  ;;  %3347 = vmatprep.mubr.msk.f32.mxu1 %vm285_vm1, %v4111_v40 }
  0x72   : > { %3487 = vmatpush3.msk.msra.mxu0 %vm334_vm0, %v3097_v51  ;;  %3465 = vmatprep.mubr.msk.f32.mxu0 %vm285_vm1, %v3985_v15 }
  0x74   : > { %3348 = vmatmul.mubr.msk.f32.gmra.mrb[10].mxu1 %vm285_vm1, %v4122_v42 }
  0x75   : > { %3466 = vmatmul.mubr.msk.f32.gmra.mrb[2].mxu0 %vm285_vm1, %v4002_v17  ;;  %3350 = vmatprep.mubr.msk.f32.mxu1 %vm285_vm1, %v4125_v43  ;;  %v4405_v17 = vld [vmem:[%s4526_s3] ss:$0 sm:$0xff] }
  0x76   : > { %3468 = vmatprep.mubr.msk.f32.mxu0 %vm285_vm1, %v4008_v19 }
  0x78   : > { %3351 = vmatmul.mubr.msk.f32.gmra.mrb[12].mxu1 %vm285_vm1, %v4138_v45 }
  0x79   : > { %3469 = vmatmul.mubr.msk.f32.gmra.mrb[4].mxu0 %vm285_vm1, %v4022_v21  ;;  %3353 = vmatprep.mubr.msk.f32.mxu1 %vm285_vm1, %v4143_v46 }
  0x7a   : > { %3471 = vmatprep.mubr.msk.f32.mxu0 %vm285_vm1, %v4180_v50 }
  0x7c   : > { %3354 = vmatmul.mubr.msk.f32.gmra.mrb[14].mxu1 %vm285_vm1, %v4155_v47 }
  0x7d   : > { %3472 = vmatmul.mubr.msk.f32.gmra.mrb[6].mxu0 %vm285_vm1, %v4193_v52  ;;  %3358 = vmatprep.mubr.msk.f32.mxu1 %vm285_vm1, %v3953_v8 }
  0x7e   : > { %3474 = vmatprep.mubr.msk.f32.mxu0 %vm285_vm1, %v4198_v53 }
  0x80   : > { %3359 = vmatmul.mubr.msk.f32.vlgmr.msra.gmra.mrb[0].mxu1 %vm285_vm1, %v3972_v12 }
  0x81   : > { %3475 = vmatmul.mubr.msk.f32.gmra.mrb[8].mxu0 %vm285_vm1, %v4210_v54  ;;  %3513 = vmatpush3.msk.msra.mxu1 %vm334_vm0, %v3917_v1  ;;  %v3061_v1 = vld [vmem:[%s3939_s9 + $0xd9] sm:$0xff]  ;;  %s3812_s9 = smov [#allocation3]  }
  0x82   : > { %3361 = vmatprep.mubr.msk.f32.mxu1 %vm285_vm1, %v3982_v14  ;;  %3477 = vmatprep.mubr.msk.f32.mxu0 %vm285_vm1, %v4213_v55  ;;  %v4400_v14 = vld [vmem:[%s4525_s2] ss:$0 sm:$0xff]  ;;  %s3720_s11 = sshll.u32 %s3812_s9, 4  ;;  %s3721_s11 = int_to_ptr.vmem [resolvable:$false] %s3720_s11 }
  0x83   : > { %s3722_s12 = scalar_lea.vmem %s3721_s11, 4096  ;;  %p3723_p2 = scmp.lt.s32.totalorder %s4465_s19, %s3721_s11 }
  0x84   : > { %3362 = vmatmul.mubr.msk.f32.gmra.mrb[2].mxu1 %vm285_vm1, %v3999_v16  ;;  %p3724_p4 = scmp.lt.s32.totalorder %s3722_s12, %s3716_s10 }
  0x85   : > { %3478 = vmatmul.mubr.msk.f32.gmra.mrb[10].mxu0 %vm285_vm1, %v4224_v56  ;;  %3364 = vmatprep.mubr.msk.f32.mxu1 %vm285_vm1, %v4005_v18 }
  0x86   : > { %3480 = vmatprep.mubr.msk.f32.mxu0 %vm285_vm1, %v3059_v63  ;;  %p3725_p5 = por %p3724_p4, %p3723_p2 }
  0x88   : > { %3365 = vmatmul.mubr.msk.f32.gmra.mrb[4].mxu1 %vm285_vm1, %v4019_v20  ;;  %p3726_p6 = pnand %p3725_p5, %p3719_p1 }
  0x89   : > { %3481 = vmatmul.mubr.msk.f32.gmra.mrb[12].mxu0 %vm285_vm1, %v3060_v0  ;;  %3367 = vmatprep.mubr.msk.f32.mxu1 %vm285_vm1, %v4025_v22 }
  0x8a   : > { %3483 = vmatprep.mubr.msk.f32.mxu0 %vm285_vm1, %v3061_v1 }
  0x8c   : > { %3368 = vmatmul.mubr.msk.f32.gmra.mrb[6].mxu1 %vm285_vm1, %v4039_v24 }
  0x8d   : > { %3484 = vmatmul.mubr.msk.f32.gmra.mrb[14].mxu0 %vm285_vm1, %v3062_v2  ;;  %3370 = vmatprep.mubr.msk.f32.mxu1 %vm285_vm1, %v4045_v26 }
  0x8e   : > { %3488 = vmatprep.mubr.msk.f32.mxu0 %vm285_vm1, %v4048_v27 }
  0x90   : > { %3371 = vmatmul.mubr.msk.f32.gmra.mrb[8].mxu1 %vm285_vm1, %v4061_v29 }
  0x91   : > { %3489 = vmatmul.mubr.msk.f32.vlgmr.msra.gmra.mrb[0].mxu0 %vm285_vm1, %v4064_v30  ;;  %3373 = vmatprep.mubr.msk.f32.mxu1 %vm285_vm1, %v4069_v31 }
  0x92   : > { %3491 = vmatprep.mubr.msk.f32.mxu0 %vm285_vm1, %v4072_v32 }
  0x94   : > { %3374 = vmatmul.mubr.msk.f32.gmra.mrb[10].mxu1 %vm285_vm1, %v4084_v33 }
  0x95   : > { %3492 = vmatmul.mubr.msk.f32.gmra.mrb[2].mxu0 %vm285_vm1, %v4087_v34  ;;  %3376 = vmatprep.mubr.msk.f32.mxu1 %vm285_vm1, %v4090_v35 }
  0x96   : > { %3494 = vmatprep.mubr.msk.f32.mxu0 %vm285_vm1, %v4093_v36 }
  0x98   : > { %3377 = vmatmul.mubr.msk.f32.gmra.mrb[12].mxu1 %vm285_vm1, %v4104_v37 }
  0x99   : > { %3495 = vmatmul.mubr.msk.f32.gmra.mrb[4].mxu0 %vm285_vm1, %v4107_v38  ;;  %3379 = vmatprep.mubr.msk.f32.mxu1 %vm285_vm1, %v4244_v59 }
  0x9a   : > { %3497 = vmatprep.mubr.msk.f32.mxu0 %vm285_vm1, %v4111_v40 }
  0x9c   : > { %3380 = vmatmul.mubr.msk.f32.gmra.mrb[14].mxu1 %vm285_vm1, %v3026_v60 }
  0x9d   : > { %3498 = vmatmul.mubr.msk.f32.gmra.mrb[6].mxu0 %vm285_vm1, %v4122_v42  ;;  %3396 = vmatprep.mubr.msk.f32.mxu1 %vm285_vm1, %v4180_v50 }
  0x9e   : > { %3500 = vmatprep.mubr.msk.f32.mxu0 %vm285_vm1, %v4125_v43 }
  0xa0   : > { %3397 = vmatmul.mubr.msk.f32.vlgmr.msra.gmra.mrb[8].mxu1 %vm285_vm1, %v4193_v52 }
  0xa1   : > { %3501 = vmatmul.mubr.msk.f32.gmra.mrb[8].mxu0 %vm285_vm1, %v4138_v45  ;;  %3399 = vmatprep.mubr.msk.f32.mxu1 %vm285_vm1, %v4198_v53 }
  0xa2   : > { %3503 = vmatprep.mubr.msk.f32.mxu0 %vm285_vm1, %v4143_v46 }
  0xa4   : > { %3400 = vmatmul.mubr.msk.f32.gmra.mrb[10].mxu1 %vm285_vm1, %v4210_v54 }
  0xa5   : > { %3504 = vmatmul.mubr.msk.f32.gmra.mrb[10].mxu0 %vm285_vm1, %v4155_v47  ;;  %3402 = vmatprep.mubr.msk.f32.mxu1 %vm285_vm1, %v4213_v55 }
  0xa6   : > { %3506 = vmatprep.mubr.msk.f32.mxu0 %vm285_vm1, %v4158_v48 }
  0xa8   : > { %3403 = vmatmul.mubr.msk.f32.gmra.mrb[12].mxu1 %vm285_vm1, %v4224_v56 }
  0xa9   : > { %3507 = vmatmul.mubr.msk.f32.gmra.mrb[12].mxu0 %vm285_vm1, %v4169_v49  ;;  %3405 = vmatprep.mubr.msk.f32.mxu1 %vm285_vm1, %v3059_v63 }
  0xaa   : > { %3509 = vmatprep.mubr.msk.f32.mxu0 %vm285_vm1, %v3095_v3 }
  0xac   : > { %3406 = vmatmul.mubr.msk.f32.gmra.mrb[14].mxu1 %vm285_vm1, %v3060_v0 }
  0xad   : > { %3510 = vmatmul.mubr.msk.f32.gmra.mrb[14].mxu0 %vm285_vm1, %v3096_v4 }
 0x153   : > { %v3360_v5 = vpop.f32.mrb[0].mxu1 }
 0x154   : > { %v1161_v6 = vpop.f32.mrb[1].mxu1 }
 0x157   : > { %v3363_v7 = vpop.f32.mrb[2].mxu1 }
 0x158   : > { %v1171_v8 = vpop.f32.mrb[3].mxu1 }
 0x15b   : > { %v3366_v9 = vpop.f32.mrb[4].mxu1 }
 0x15c   : > { %v1181_v10 = vpop.f32.mrb[5].mxu1 }
 0x15f   : > { %v3369_v11 = vpop.f32.mrb[6].mxu1 }
 0x160   : > { %v1191_v12 = vpop.f32.mrb[7].mxu1 }
 0x164   : > { %v3490_v13 = vpop.f32.mrb[0].mxu0 }
 0x165   : > { %v3514_v15 = vadd.f32 %v3490_v13, %v3360_v5  ;;  %v2474_v16 = vpop.f32.mrb[1].mxu0 }
 0x166   : > { %v3515_v18 = vadd.f32 %v2474_v16, %v1161_v6 }
 0x167   : > { %v2625_v19 = vmul.f32 %v3514_v15, %v4400_v14 }
 0x168   : > { %v2624_v20 = vmul.f32 %v3515_v18, %v4400_v14  ;;  %v3493_v21 = vpop.f32.mrb[2].mxu0 }
 0x169   : > { %v2648_v22 = vadd.f32 %v4405_v17, %v2625_v19  ;;  %v3516_v23 = vadd.f32 %v3493_v21, %v3363_v7  ;;  %v2484_v24 = vpop.f32.mrb[3].mxu0 }
 0x16a   : > { %v2647_v25 = vadd.f32 %v4405_v17, %v2624_v20  ;;  %v3517_v26 = vadd.f32 %v2484_v24, %v1171_v8 }
 0x16b   : > { %v2664_v27 = vmax.f32 %v2648_v22, 0.0  ;;  %v2627_v28 = vmul.f32 %v3516_v23, %v4400_v14 }
 0x16c   : > { %v2663_v29 = vmax.f32 %v2647_v25, 0.0  ;;  %v2626_v30 = vmul.f32 %v3517_v26, %v4400_v14  ;;  %v3496_v31 = vpop.f32.mrb[4].mxu0 }
 0x16d   : > { %2680 = vst [vmem:[%s4415_s13 + $0x8] sm:$0xff] %v2664_v27  ;;  %v2650_v32 = vadd.f32 %v4405_v17, %v2627_v28  ;;  %v3518_v33 = vadd.f32 %v3496_v31, %v3366_v9  ;;  %v2494_v34 = vpop.f32.mrb[5].mxu0 }
 0x16e   : > { %2679 = vst [vmem:[%s4415_s13] sm:$0xff] %v2663_v29  ;;  %v2649_v35 = vadd.f32 %v4405_v17, %v2626_v30  ;;  %v3519_v36 = vadd.f32 %v2494_v34, %v1181_v10 }
 0x16f   : > { %v2666_v37 = vmax.f32 %v2650_v32, 0.0  ;;  %v2629_v38 = vmul.f32 %v3518_v33, %v4400_v14 }
 0x170   : > { %v2665_v39 = vmax.f32 %v2649_v35, 0.0  ;;  %v2628_v40 = vmul.f32 %v3519_v36, %v4400_v14  ;;  %v3499_v41 = vpop.f32.mrb[6].mxu0 }
 0x171   : > { %2682 = vst [vmem:[%s4415_s13 + $0x18] sm:$0xff] %v2666_v37  ;;  %v2652_v42 = vadd.f32 %v4405_v17, %v2629_v38  ;;  %v3520_v43 = vadd.f32 %v3499_v41, %v3369_v11  ;;  %v2504_v44 = vpop.f32.mrb[7].mxu0 }
 0x172   : > { %2681 = vst [vmem:[%s4415_s13 + $0x10] sm:$0xff] %v2665_v39  ;;  %v2651_v45 = vadd.f32 %v4405_v17, %v2628_v40  ;;  %v3521_v46 = vadd.f32 %v2504_v44, %v1191_v12 }
 0x173   : > { %v2668_v47 = vmax.f32 %v2652_v42, 0.0  ;;  %v2631_v48 = vmul.f32 %v3520_v43, %v4400_v14  ;;  %v3398_v51 = vpop.f32.mrb[8].mxu1 }
 0x174   : > { %v2667_v49 = vmax.f32 %v2651_v45, 0.0  ;;  %v2630_v50 = vmul.f32 %v3521_v46, %v4400_v14  ;;  %v3502_v52 = vpop.f32.mrb[8].mxu0  ;;  %v1463_v55 = vpop.f32.mrb[9].mxu1 }
 0x175   : > { %2684 = vst [vmem:[%s4415_s13 + $0x28] sm:$0xff] %v2668_v47  ;;  %v2654_v53 = vadd.f32 %v4405_v17, %v2631_v48  ;;  %v3522_v54 = vadd.f32 %v3502_v52, %v3398_v51  ;;  %v2514_v56 = vpop.f32.mrb[9].mxu0 }
 0x176   : > { %2683 = vst [vmem:[%s4415_s13 + $0x20] sm:$0xff] %v2667_v49  ;;  %v2653_v57 = vadd.f32 %v4405_v17, %v2630_v50  ;;  %v3523_v58 = vadd.f32 %v2514_v56, %v1463_v55 }
 0x177   : > { %v2670_v59 = vmax.f32 %v2654_v53, 0.0  ;;  %v2633_v60 = vmul.f32 %v3522_v54, %v4400_v14  ;;  %v3401_v63 = vpop.f32.mrb[10].mxu1 }
 0x178   : > { %v2669_v61 = vmax.f32 %v2653_v57, 0.0  ;;  %v2632_v62 = vmul.f32 %v3523_v58, %v4400_v14  ;;  %v3505_v0 = vpop.f32.mrb[10].mxu0  ;;  %v1473_v3 = vpop.f32.mrb[11].mxu1 }
 0x179   : > { %2686 = vst [vmem:[%s4415_s13 + $0x38] sm:$0xff] %v2670_v59  ;;  %v2656_v1 = vadd.f32 %v4405_v17, %v2633_v60  ;;  %v3524_v2 = vadd.f32 %v3505_v0, %v3401_v63  ;;  %v2524_v4 = vpop.f32.mrb[11].mxu0 }
 0x17a   : > { %2685 = vst [vmem:[%s4415_s13 + $0x30] sm:$0xff] %v2669_v61  ;;  %v2655_v5 = vadd.f32 %v4405_v17, %v2632_v62  ;;  %v3525_v6 = vadd.f32 %v2524_v4, %v1473_v3 }
 0x17b   : > { %v2672_v7 = vmax.f32 %v2656_v1, 0.0  ;;  %v2635_v8 = vmul.f32 %v3524_v2, %v4400_v14  ;;  %v3404_v11 = vpop.f32.mrb[12].mxu1 }
 0x17c   : > { %v2671_v9 = vmax.f32 %v2655_v5, 0.0  ;;  %v2634_v10 = vmul.f32 %v3525_v6, %v4400_v14  ;;  %v3508_v12 = vpop.f32.mrb[12].mxu0  ;;  %v1483_v16 = vpop.f32.mrb[13].mxu1 }
 0x17d   : > { %2688 = vst [vmem:[%s4415_s13 + $0x48] sm:$0xff] %v2672_v7  ;;  %v2658_v13 = vadd.f32 %v4405_v17, %v2635_v8  ;;  %v3526_v15 = vadd.f32 %v3508_v12, %v3404_v11  ;;  %v2534_v18 = vpop.f32.mrb[13].mxu0 }
 0x17e   : > { %2687 = vst [vmem:[%s4415_s13 + $0x40] sm:$0xff] %v2671_v9  ;;  %v2657_v19 = vadd.f32 %v4405_v17, %v2634_v10  ;;  %v3527_v20 = vadd.f32 %v2534_v18, %v1483_v16 }
 0x17f   : > { %v2674_v21 = vmax.f32 %v2658_v13, 0.0  ;;  %v2637_v22 = vmul.f32 %v3526_v15, %v4400_v14  ;;  %v3407_v25 = vpop.f32.mrb[14].mxu1 }
 0x180   : > { %v2673_v23 = vmax.f32 %v2657_v19, 0.0  ;;  %v2636_v24 = vmul.f32 %v3527_v20, %v4400_v14  ;;  %v3511_v26 = vpop.f32.mrb[14].mxu0  ;;  %v1493_v29 = vpop.f32.mrb[15].mxu1 }
 0x181   : > { %2690 = vst [vmem:[%s4415_s13 + $0x58] sm:$0xff] %v2674_v21  ;;  %v2660_v27 = vadd.f32 %v4405_v17, %v2637_v22  ;;  %v3528_v28 = vadd.f32 %v3511_v26, %v3407_v25  ;;  %v2544_v30 = vpop.f32.mrb[15].mxu0 }
 0x182   : > { %2689 = vst [vmem:[%s4415_s13 + $0x50] sm:$0xff] %v2673_v23  ;;  %v2659_v31 = vadd.f32 %v4405_v17, %v2636_v24  ;;  %v3529_v32 = vadd.f32 %v2544_v30, %v1493_v29 }
 0x183   : > { %v2676_v33 = vmax.f32 %v2660_v27, 0.0  ;;  %v2639_v34 = vmul.f32 %v3528_v28, %v4400_v14 }
 0x184   : > { %v2675_v35 = vmax.f32 %v2659_v31, 0.0  ;;  %v2638_v36 = vmul.f32 %v3529_v32, %v4400_v14 }
 0x185   : > { %2692 = vst [vmem:[%s4415_s13 + $0x68] sm:$0xff] %v2676_v33  ;;  %v2662_v37 = vadd.f32 %v4405_v17, %v2639_v34 }
 0x186   : > { %2691 = vst [vmem:[%s4415_s13 + $0x60] sm:$0xff] %v2675_v35  ;;  %v2661_v38 = vadd.f32 %v4405_v17, %v2638_v36 }
 0x187   : > { %v2678_v39 = vmax.f32 %v2662_v37, 0.0 }
 0x188   : > { %v2677_v14 = vmax.f32 %v2661_v38, 0.0 }
 0x189   : > { %2694 = vst [vmem:[%s4415_s13 + $0x78] sm:$0xff] %v2678_v39 }
 0x18a   : > { %2693 = vst [vmem:[%s4415_s13 + $0x70] sm:$0xff] %v2677_v14 }
 0x18b   : > { %3729 = shalt.err (!%p3726_p6)
}
 0x18c   : > { %s3730_s6 = scalar_lea.hbm %s4463_s5, 2048  ;;  %s3734_s23 = scalar_lea.hbm %s4527_s4, 8192 }
 0x18d   : > { %p3731_p7 = scmp.ne.s32.totalorder %s4463_s5, %s3730_s6  ;;  %p3735_p11 = scmp.lt.u32.totalorder %s4463_s5, %s4527_s4 }
 0x18e   : > { %p3736_p12 = scmp.lt.u32.totalorder %s3734_s23, %s3730_s6  ;;  %p3738_p0 = scmp.lt.u32.totalorder %s3730_s6, %s4463_s5 }
 0x18f   : > { %p3732_p9 = pnand %p3731_p7, %p3891_p3 }
 0x190   : > { %p3737_p13 = por %p3736_p12, %p3735_p11 }
 0x191   : > { %p3733_p10 = pneg %p3732_p9 }
 0x192   : > { %p3739_p1 = por %p3738_p0, %p3737_p13 }
 0x194   : > { %p3740_p2 = pnand %p3739_p1, %p3733_p10 }
 0x196   : > { %3743 = shalt.err (!%p3740_p2)
}
 0x197   : > { %s3813_s27 = smov 128   ;;  %s3814_s30 = smov 8  }
 0x198   : > { %3643 = dma.vmem_to_hbm [thread:$0]  (%p3891_p3), %s4465_s19, 2048, %s4463_s5, %s4471_s8, %s3813_s27, %s3813_s27, %s3814_s30  }
 0x199 PF: > { %p3649_p4 = scmp.ge.s32.totalorder %s3810_s22, 2  ;;  %s2728_s10 = sand.u32 1, %s3782_s15  }
 0x19a   : > { %s2729_s9 = scalar_lea.sflag [#allocation4], %s2728_s10 }
 0x19b   : > { %p3646_p5 = pnand %p3649_p4, %p3900_p8 }
 0x19d   : > { %3777 = dma.done.wait (!%p3646_p5), %s2729_s9, 2048  }
 0x19e   : > { %3779 = vsyncadd (!%p3646_p5), %s2729_s9, 4294965248  ;;  %s17_s22 = sadd.s32 1, %s3810_s22   ;;  %s4530_s15 = smov %s3786_s16 }
 0x19f   : > { %p14_p6 = scmp.ge.s32.totalorder %s17_s22, 6   ;;  %s4531_s16 = smov %s3790_s17 }
 0x1a0   : > { %s4532_s17 = smov %s3909_s7  ;;  %s4533_s18 = smov %s3802_s20 }
 0x1a1   : > { %s4534_s19 = smov %s3806_s21  ;;  %s4535_s20 = smov %s4538_s25 }
 0x1a2   : > { %s4536_s21 = smov %s4542_s26  ;;  %16 = sbr.rel (!%p14_p6) target bundleno = 5 (0x5), region = 91 }
 0x1a9   :  { %2734 = vsyncpa [#allocation4], 1 }
 0x1aa   :  { %2736 = vsyncpa [#allocation4 + $0x1], 1 }

</bundles_post_ra>
